<compile_context>
chip_gen: v5e
topology: v5e:2x2
jax: 0.10.0
libtpu: 0.0.40
codegen_flags: <defaults>
</compile_context>

<pallas_src>
import math
import functools

import jax
import jax.numpy as jnp
from jax import lax
from jax.experimental import pallas as pl
from jax.experimental.pallas import tpu as pltpu


_INV_SQRT2 = 1.0 / math.sqrt(2.0)


def _gelu(x, approximate):
    if approximate:
        # tanh-approx lowers to EUP (frees the VALU slot on v6e/v7x).
        return jax.nn.gelu(x, approximate=True)
    # Exact erf formulation (PyTorch nn.GELU default) for parity.
    return 0.5 * x * (1.0 + lax.erf(x * _INV_SQRT2))


def _round_up(x, m):
    return (x + m - 1) // m * m


def _vmem_capacity_bytes():
    # Per-TensorCore VMEM: 128 MiB on v5e/v6e, 64 MiB on v7x.
    try:
        return int(pltpu.get_tpu_info().vmem_capacity_bytes)
    except Exception:
        return 64 << 20  # conservative fallback (v7x)


def _make_kernel(approx_gelu):
    def mlp_kernel(x_ref, w1_ref, b1_ref, w2_ref, b2_ref, o_ref, acc_ref):
        k = pl.program_id(1)

        @pl.when(k == 0)
        def _():
            acc_ref[...] = jnp.zeros_like(acc_ref)

        # fc1 slab: (tm, C_in) @ (C_in, tk) -> f32 accumulation on the MXU.
        h = jnp.dot(x_ref[...], w1_ref[...], preferred_element_type=jnp.float32)
        h = _gelu(h + b1_ref[...].astype(jnp.float32), approx_gelu)
        # dropout (p=0.1) is identity in eval mode.
        # fc2 slab: (tm, tk) @ (tk, C_out), accumulated across k in f32.
        acc_ref[...] += jnp.dot(h.astype(w2_ref.dtype), w2_ref[...],
                                preferred_element_type=jnp.float32)

        @pl.when(k == pl.num_programs(1) - 1)
        def _():
            o_ref[...] = (acc_ref[...]
                          + b2_ref[...].astype(jnp.float32)).astype(o_ref.dtype)

    return mlp_kernel


@functools.partial(jax.jit, static_argnames=("tm", "tk", "approx_gelu"))
def mlp_forward(x, w1, b1, w2, b2, *, tm=256, tk=None, approx_gelu=False):
    """x: [B, N, C_in] -> [B, N, C_out]. w1: [C_in, C_hid], w2: [C_hid, C_out]."""
    B, N, C_in = x.shape
    C_hid = w1.shape[1]
    C_out = w2.shape[1]
    M = B * N

    out_dtype = x.dtype
    compute_dtype = w1.dtype  # bf16 weights -> bf16 MXU fast path, f32 accum.

    # Lane-dense padding targets: every feature axis a multiple of 128.
    C_in_p = _round_up(C_in, 128)
    C_hid_p = _round_up(C_hid, 128)
    C_out_p = _round_up(C_out, 128)

    # Row tile: clamp for small inputs and guarantee >= 2 row steps when
    # possible so the "parallel" axis can feed both v7x TensorCores.
    tm_cap = max(8, _round_up(-(-M // 2), 8))
    tm_eff = min(_round_up(tm, 8), tm_cap)
    M_p = _round_up(M, tm_eff)

    # --- Wrapper-side prep: cast x once to the compute dtype (fuses with the
    #     pad); skip pads entirely when dims are already aligned. ---
    x2d = x.reshape(M, C_in)
    if x2d.dtype != compute_dtype:
        x2d = x2d.astype(compute_dtype)
    if (M_p != M) or (C_in_p != C_in):
        x2d = jnp.pad(x2d, ((0, M_p - M), (0, C_in_p - C_in)))

    w1_p = (jnp.pad(w1, ((0, C_in_p - C_in), (0, C_hid_p - C_hid)))
            if (C_in_p != C_in or C_hid_p != C_hid) else w1)
    b1_p = (jnp.pad(b1, (0, C_hid_p - C_hid)) if C_hid_p != C_hid else b1
            ).reshape(1, C_hid_p)
    w2_p = (jnp.pad(w2, ((0, C_hid_p - C_hid), (0, C_out_p - C_out)))
            if (C_hid_p != C_hid or C_out_p != C_out) else w2)
    b2_p = (jnp.pad(b2, (0, C_out_p - C_out)) if C_out_p != C_out else b2
            ).reshape(1, C_out_p)

    vmem_cap = _vmem_capacity_bytes()
    w_isz = jnp.dtype(compute_dtype).itemsize
    x_isz = w_isz                       # x was cast to the compute dtype
    o_isz = jnp.dtype(out_dtype).itemsize

    def _vmem_need(tk_):
        n_k = C_hid_p // tk_
        wbuf = 1 if n_k == 1 else 2     # constant blocks are single-buffered
        return (wbuf * (C_in_p * tk_ + tk_ * C_out_p) * w_isz    # w1/w2 slabs
                + wbuf * 8 * tk_ * w_isz + 8 * C_out_p * w_isz   # biases (8-sublane pad)
                + 2 * tm_eff * C_in_p * x_isz                     # x tiles
                + 2 * tm_eff * C_out_p * o_isz                    # out tiles
                + tm_eff * C_out_p * 4                            # f32 accumulator
                + tm_eff * tk_ * (4 + w_isz))                     # h (f32) + recast

    # --- Hidden-dim tile: largest 128-multiple divisor of C_hid_p that fits
    #     the VMEM budget. tk == C_hid_p means fully-resident weights. ---
    if tk is None:
        kb = C_hid_p // 128
        budget = int(0.70 * vmem_cap)
        tk_eff = 128
        for d in sorted((d for d in range(1, kb + 1) if kb % d == 0),
                        reverse=True):
            cand = d * 128
            if _vmem_need(cand) <= budget:
                tk_eff = cand
                break
    else:
        assert tk % 128 == 0 and C_hid_p % tk == 0, "tk must be a 128-multiple divisor of padded hidden dim"
        tk_eff = tk

    num_k = C_hid_p // tk_eff
    n_row = M_p // tm_eff
    weights_resident = (num_k == 1)

    # --- VMEM limit: footprint + margin, capped below detected capacity. ---
    vmem_needed = _vmem_need(tk_eff)
    vmem_limit = int(1.25 * vmem_needed) + (4 << 20)
    vmem_limit = max(vmem_limit, 32 << 20)
    vmem_limit = min(vmem_limit, vmem_cap - (8 << 20))  # headroom for compiler scratch
    vmem_limit = int(max(vmem_limit, 16 << 20))

    def _nbytes(a):
        return int(a.size) * a.dtype.itemsize

    w_bytes = _nbytes(w1_p) + _nbytes(b1_p) + _nbytes(w2_p) + _nbytes(b2_p)
    cost = pl.CostEstimate(
        flops=2 * M_p * (C_in_p * C_hid_p + C_hid_p * C_out_p),
        transcendentals=M_p * C_hid_p,
        bytes_accessed=(int(x2d.size) * x_isz
                        + w_bytes * (n_row if num_k > 1 else 1)
                        + M_p * C_out_p * o_isz),
    )

    def _wspec(shape, index_map, constant):
        if constant:
            # Constant block index across the whole grid: single buffer.
            return pl.BlockSpec(shape, index_map, pipeline_mode=pl.Buffered(1))
        return pl.BlockSpec(shape, index_map)

    in_specs = [
        # x tile: streamed over rows, constant across k -> default dbl-buffer.
        pl.BlockSpec((tm_eff, C_in_p), lambda i, k: (i, 0)),
        _wspec((C_in_p, tk_eff), lambda i, k: (0, k), weights_resident),
        _wspec((1, tk_eff), lambda i, k: (0, k), weights_resident),
        _wspec((tk_eff, C_out_p), lambda i, k: (k, 0), weights_resident),
        _wspec((1, C_out_p), lambda i, k: (0, 0), True),  # b2 always constant
    ]

    out2d = pl.pallas_call(
        _make_kernel(approx_gelu),
        out_shape=jax.ShapeDtypeStruct((M_p, C_out_p), out_dtype),
        grid_spec=pltpu.PrefetchScalarGridSpec(
            num_scalar_prefetch=0,
            grid=(n_row, num_k),
            in_specs=in_specs,
            out_specs=pl.BlockSpec((tm_eff, C_out_p), lambda i, k: (i, 0)),
            scratch_shapes=[pltpu.VMEM((tm_eff, C_out_p), jnp.float32)],
        ),
        compiler_params=pltpu.CompilerParams(
            dimension_semantics=("parallel", "arbitrary"),
            vmem_limit_bytes=vmem_limit,
        ),
        cost_estimate=cost,
    )(x2d, w1_p, b1_p, w2_p, b2_p)

    return out2d[:M, :C_out].reshape(B, N, C_out)


def init_mlp_params(key, in_features, hidden_features=None, out_features=None,
                    dtype=jnp.float32):
    """Deterministic init mimicking nn.Linear: U(-1/sqrt(fan_in), 1/sqrt(fan_in)).
    Weights are stored pre-transposed: w1 [in, hidden], w2 [hidden, out].
    Note: serving in bf16 (dtype=jnp.bfloat16) hits the MXU fast path."""
    hidden_features = hidden_features or in_features
    out_features = out_features or in_features
    k1, k2, k3, k4 = jax.random.split(key, 4)
    bound1 = 1.0 / math.sqrt(in_features)
    bound2 = 1.0 / math.sqrt(hidden_features)
    w1 = jax.random.uniform(k1, (in_features, hidden_features), dtype,
                            minval=-bound1, maxval=bound1)
    b1 = jax.random.uniform(k2, (hidden_features,), dtype,
                            minval=-bound1, maxval=bound1)
    w2 = jax.random.uniform(k3, (hidden_features, out_features), dtype,
                            minval=-bound2, maxval=bound2)
    b2 = jax.random.uniform(k4, (out_features,), dtype,
                            minval=-bound2, maxval=bound2)
    return w1, b1, w2, b2


if __name__ == "__main__":
    key = jax.random.PRNGKey(0)
    kx, kp = jax.random.split(key)

    B, N = 2, 8            # batch, sequence length
    in_features = 32
    hidden_features = 64
    out_features = 32      # defaults to in_features in the PyTorch module

    x = jax.random.normal(kx, (B, N, in_features), dtype=jnp.float32)
    w1, b1, w2, b2 = init_mlp_params(kp, in_features, hidden_features,
                                     out_features)

    # Fused (fully-resident weights, num_k == 1) path.
    y = mlp_forward(x, w1, b1, w2, b2)
    jax.block_until_ready(y)

    h_ref = _gelu(x @ w1 + b1, False)
    y_ref = h_ref @ w2 + b2
    assert y.shape == (B, N, out_features)
    assert jnp.allclose(y, y_ref, atol=2e-3, rtol=2e-3), (
        float(jnp.max(jnp.abs(y - y_ref))))

    # Hidden-dim streaming (accumulator) path: force 2 k-steps with tk=128.
    hid2 = 256
    w1b, b1b, w2b, b2b = init_mlp_params(jax.random.PRNGKey(1), in_features,
                                         hid2, out_features)
    y2 = mlp_forward(x, w1b, b1b, w2b, b2b, tk=128)
    jax.block_until_ready(y2)
    y2_ref = _gelu(x @ w1b + b1b, False) @ w2b + b2b
    assert jnp.allclose(y2, y2_ref, atol=2e-3, rtol=2e-3), (
        float(jnp.max(jnp.abs(y2 - y2_ref))))

    print("KERNEL_OK")
</pallas_src>

<mosaic_0001>
module attributes {stable_mosaic.version = 11 : i64} {
  func.func @mlp_kernel(%arg0: i32, %arg1: i32, %arg2: memref<8x128xf32, #tpu.memory_space<vmem>>, %arg3: memref<128x128xf32, #tpu.memory_space<vmem>>, %arg4: memref<1x128xf32, #tpu.memory_space<vmem>>, %arg5: memref<128x128xf32, #tpu.memory_space<vmem>>, %arg6: memref<1x128xf32, #tpu.memory_space<vmem>>, %arg7: memref<8x128xf32, #tpu.memory_space<vmem>>, %arg8: memref<8x128xf32, #tpu.memory_space<vmem>>) attributes {dimension_semantics = [#tpu.dimension_semantics<parallel>, #tpu.dimension_semantics<arbitrary>], iteration_bounds = array<i64: 2, 1>, scalar_prefetch = 0 : i64, scratch_operands = 1 : i64, tpu.core_type = #tpu.core_type<tc>, window_params = [{transform_indices = @transform_0, window_bounds = array<i64: 8, 128>}, {pipeline_mode = #tpu.pipeline_mode<synchronous>, transform_indices = @transform_1, window_bounds = array<i64: 128, 128>}, {pipeline_mode = #tpu.pipeline_mode<synchronous>, transform_indices = @transform_2, window_bounds = array<i64: 1, 128>}, {pipeline_mode = #tpu.pipeline_mode<synchronous>, transform_indices = @transform_3, window_bounds = array<i64: 128, 128>}, {pipeline_mode = #tpu.pipeline_mode<synchronous>, transform_indices = @transform_4, window_bounds = array<i64: 1, 128>}, {transform_indices = @transform_5, window_bounds = array<i64: 8, 128>}]} {
    %c0_i32 = arith.constant 0 : i32
    %0 = arith.cmpi eq, %arg1, %c0_i32 : i32
    %1 = arith.extui %0 : i1 to i32
    %c0_i32_0 = arith.constant 0 : i32
    %2 = arith.cmpi ne, %1, %c0_i32_0 : i32
    scf.if %2 {
      %cst_18 = arith.constant 0.000000e+00 : f32
      %25 = vector.broadcast %cst_18 : f32 to vector<8x128xf32>
      %c0_19 = arith.constant 0 : index
      %c0_20 = arith.constant 0 : index
      %26 = vector.load %arg8[%c0_19, %c0_20] : memref<8x128xf32, #tpu.memory_space<vmem>>, vector<8x128xf32>
      tpu.vector_store %arg8[%c0_19, %c0_20], %25 {strides = array<i32>} : memref<8x128xf32, #tpu.memory_space<vmem>>, vector<8x128xf32>,
    } else {
    }
    %c0 = arith.constant 0 : index
    %c0_1 = arith.constant 0 : index
    %3 = vector.load %arg2[%c0, %c0_1] : memref<8x128xf32, #tpu.memory_space<vmem>>, vector<8x128xf32>
    %c0_2 = arith.constant 0 : index
    %c0_3 = arith.constant 0 : index
    %4 = vector.load %arg3[%c0_2, %c0_3] : memref<128x128xf32, #tpu.memory_space<vmem>>, vector<128x128xf32>
    %cst = arith.constant dense<0.000000e+00> : vector<8x128xf32>
    %5 = tpu.matmul %3, %4, %cst {dimension_numbers = #tpu.dot_dimension_numbers<[1], [0], [0], [1], [0, 0, 1, 1], [], []>} : vector<8x128xf32>, vector<128x128xf32>, vector<8x128xf32> -> vector<8x128xf32>
    %c0_4 = arith.constant 0 : index
    %c0_5 = arith.constant 0 : index
    %6 = vector.load %arg4[%c0_4, %c0_5] : memref<1x128xf32, #tpu.memory_space<vmem>>, vector<1x128xf32>
    %7 = vector.broadcast %6 : vector<1x128xf32> to vector<8x128xf32>
    %8 = arith.addf %5, %7 : vector<8x128xf32>
    %cst_6 = arith.constant 5.000000e-01 : f32
    %9 = vector.broadcast %cst_6 : f32 to vector<8x128xf32>
    %10 = arith.mulf %9, %8 : vector<8x128xf32>
    %cst_7 = arith.constant 0.707106769 : f32
    %11 = vector.broadcast %cst_7 : f32 to vector<8x128xf32>
    %12 = arith.mulf %8, %11 : vector<8x128xf32>
    %13 = math.erf %12 : vector<8x128xf32>
    %cst_8 = arith.constant 1.000000e+00 : f32
    %14 = vector.broadcast %cst_8 : f32 to vector<8x128xf32>
    %15 = arith.addf %14, %13 : vector<8x128xf32>
    %16 = arith.mulf %10, %15 : vector<8x128xf32>
    %c0_9 = arith.constant 0 : index
    %c0_10 = arith.constant 0 : index
    %17 = vector.load %arg8[%c0_9, %c0_10] : memref<8x128xf32, #tpu.memory_space<vmem>>, vector<8x128xf32>
    %c0_11 = arith.constant 0 : index
    %c0_12 = arith.constant 0 : index
    %18 = vector.load %arg5[%c0_11, %c0_12] : memref<128x128xf32, #tpu.memory_space<vmem>>, vector<128x128xf32>
    %cst_13 = arith.constant dense<0.000000e+00> : vector<8x128xf32>
    %19 = tpu.matmul %16, %18, %cst_13 {dimension_numbers = #tpu.dot_dimension_numbers<[1], [0], [0], [1], [0, 0, 1, 1], [], []>} : vector<8x128xf32>, vector<128x128xf32>, vector<8x128xf32> -> vector<8x128xf32>
    %20 = arith.addf %17, %19 : vector<8x128xf32>
    %c0_14 = arith.constant 0 : index
    %c0_15 = arith.constant 0 : index
    %21 = vector.load %arg8[%c0_14, %c0_15] : memref<8x128xf32, #tpu.memory_space<vmem>>, vector<8x128xf32>
    tpu.vector_store %arg8[%c0_14, %c0_15], %20 {strides = array<i32>} : memref<8x128xf32, #tpu.memory_space<vmem>>, vector<8x128xf32>,
    %c0_i32_16 = arith.constant 0 : i32
    %22 = arith.cmpi eq, %arg1, %c0_i32_16 : i32
    %23 = arith.extui %22 : i1 to i32
    %c0_i32_17 = arith.constant 0 : i32
    %24 = arith.cmpi ne, %23, %c0_i32_17 : i32
    scf.if %24 {
      %c0_18 = arith.constant 0 : index
      %c0_19 = arith.constant 0 : index
      %25 = vector.load %arg8[%c0_18, %c0_19] : memref<8x128xf32, #tpu.memory_space<vmem>>, vector<8x128xf32>
      %c0_20 = arith.constant 0 : index
      %c0_21 = arith.constant 0 : index
      %26 = vector.load %arg6[%c0_20, %c0_21] : memref<1x128xf32, #tpu.memory_space<vmem>>, vector<1x128xf32>
      %27 = vector.broadcast %26 : vector<1x128xf32> to vector<8x128xf32>
      %28 = arith.addf %25, %27 : vector<8x128xf32>
      %c0_22 = arith.constant 0 : index
      %c0_23 = arith.constant 0 : index
      %29 = vector.load %arg7[%c0_22, %c0_23] : memref<8x128xf32, #tpu.memory_space<vmem>>, vector<8x128xf32>
      tpu.vector_store %arg7[%c0_22, %c0_23], %28 {strides = array<i32>} : memref<8x128xf32, #tpu.memory_space<vmem>>, vector<8x128xf32>,
    } else {
    }
    return
  }
  func.func @transform_0(%arg0: i32, %arg1: i32) -> (i32, i32) {
    %c0_i32 = arith.constant 0 : i32
    %c0_i32_0 = arith.constant 0 : i32
    return %arg0, %c0_i32 : i32, i32
  }
  func.func @transform_1(%arg0: i32, %arg1: i32) -> (i32, i32) {
    %c0_i32 = arith.constant 0 : i32
    %c0_i32_0 = arith.constant 0 : i32
    return %c0_i32, %arg1 : i32, i32
  }
  func.func @transform_2(%arg0: i32, %arg1: i32) -> (i32, i32) {
    %c0_i32 = arith.constant 0 : i32
    %c0_i32_0 = arith.constant 0 : i32
    return %c0_i32, %arg1 : i32, i32
  }
  func.func @transform_3(%arg0: i32, %arg1: i32) -> (i32, i32) {
    %c0_i32 = arith.constant 0 : i32
    %c0_i32_0 = arith.constant 0 : i32
    return %arg1, %c0_i32 : i32, i32
  }
  func.func @transform_4(%arg0: i32, %arg1: i32) -> (i32, i32) {
    %c0_i32 = arith.constant 0 : i32
    %c0_i32_0 = arith.constant 0 : i32
    %c0_i32_1 = arith.constant 0 : i32
    return %c0_i32, %c0_i32_0 : i32, i32
  }
  func.func @transform_5(%arg0: i32, %arg1: i32) -> (i32, i32) {
    %c0_i32 = arith.constant 0 : i32
    %c0_i32_0 = arith.constant 0 : i32
    return %arg0, %c0_i32 : i32, i32
  }
}

</mosaic_0001>

<bundles_post_ra>
// kernel: mlp_forward.1
= control target key start
LH: loop header
LB: loop body
LE: loop exit
PB: predicated region body
PF: predicated region fallthrough
CT: control target
= control target key end

     0   :  { %s623_s18 = smov 0   ;;  %s625_s19 = smov 0   ;;  %s769_s0 = inlined_call_operand.vmem [shape: f32[16,128], index: 0, kind: input, shape index: {}]   ;;  %s770_s1 = inlined_call_operand.vmem [shape: f32[128,128], index: 1, kind: input, shape index: {}]   ;;  %s771_s2 = inlined_call_operand.vmem [shape: f32[1,128], index: 2, kind: input, shape index: {}]   ;;  %s772_s3 = inlined_call_operand.vmem [shape: f32[128,128], index: 3, kind: input, shape index: {}]   ;;  %s773_s4 = inlined_call_operand.vmem [shape: f32[1,128], index: 4, kind: input, shape index: {}]   ;;  %s774_s5 = inlined_call_operand.vmem [shape: f32[16,128], index: 5, kind: output, shape index: {}]  }
   0x1   :  { %s627_s20 = smov 0  }
   0x2 LB: > { %s27_s21 = sadd.s32 1, %s587_s19  ;;  %p535_p0 = scmp.ge.s32.totalorder %s591_s20, 1  ;;  %s591_s20 = sphi %s627_s20, %s15_s20   ;;  %s587_s19 = sphi %s625_s19, %s776_s19   ;;  %s583_s18 = sphi %s623_s18, %s775_s18  }
   0x3   : > { %p29_p1 = scmp.ge.s32.totalorder %s27_s21, 2  ;;  %p226_p2 = scmp.lt.s32.totalorder %s591_s20, 3 }
   0x5   : > { %s778_s21 = smov (%p29_p1, %s27_s21), 0  ;;  %p227_p3 = pnand %p535_p0, %p226_p2 }
   0x6   : > { %p264_p4 = scmp.lt.s32.totalorder (!%p227_p3), %s583_s18, 1 }
   0x7   : > { %230 = sbr.rel (%p227_p3) target bundleno = 352 (0x160), region = 40 }
   0xc   : > { %v306_v0 = vld [vmem:[%s770_s1 + $0x78] sm:$0xff]  ;;  %v305_v1 = vld [vmem:[%s770_s1 + $0x70] sm:$0xff]  ;;  %v304_v2 = vld [vmem:[%s770_s1 + $0x68] sm:$0xff]  ;;  %s780_s18 = smov (!%p264_p4, %s583_s18), 1 }
   0xd   : > { %311 = vmatpush.msra.mxu0 %v306_v0  ;;  %v303_v3 = vld [vmem:[%s770_s1 + $0x60] sm:$0xff]  ;;  %v302_v4 = vld [vmem:[%s770_s1 + $0x58] sm:$0xff]  ;;  %v301_v5 = vld [vmem:[%s770_s1 + $0x50] sm:$0xff]  ;;  %s536_s27 = sshll.u32 %s780_s18, 3 }
   0xe   : > { %v300_v6 = vld [vmem:[%s770_s1 + $0x48] sm:$0xff]  ;;  %v299_v7 = vld [vmem:[%s770_s1 + $0x40] sm:$0xff]  ;;  %v298_v8 = vld [vmem:[%s770_s1 + $0x38] sm:$0xff]  ;;  %s267_s9 = scalar_lea.vmem %s769_s0, %s536_s27  ;;  %s284_s10 = scalar_lea.vmem %s774_s5, %s536_s27 }
   0xf   : > { %312 = vmatpush.msra.mxu0 %v305_v1  ;;  %v297_v9 = vld [vmem:[%s770_s1 + $0x30] sm:$0xff]  ;;  %v296_v10 = vld [vmem:[%s770_s1 + $0x28] sm:$0xff]  ;;  %v295_v11 = vld [vmem:[%s770_s1 + $0x20] sm:$0xff] }
  0x10   : > { %v294_v12 = vld [vmem:[%s770_s1 + $0x18] sm:$0xff]  ;;  %v293_v13 = vld [vmem:[%s770_s1 + $0x10] sm:$0xff]  ;;  %v292_v14 = vld [vmem:[%s770_s1 + $0x8] sm:$0xff] }
  0x11   : > { %313 = vmatpush.msra.mxu0 %v304_v2  ;;  %v291_v15 = vld [vmem:[%s770_s1] sm:$0xff]  ;;  %v391_v17 = vld [vmem:[%s772_s3 + $0x78] sm:$0xff]  ;;  %v390_v18 = vld [vmem:[%s772_s3 + $0x70] sm:$0xff] }
  0x12   : > { %v290_v16 = vld [vmem:[%s267_s9] sm:$0xff]  ;;  %392 = vmatpush.msra.mxu1 %v391_v17  ;;  %v389_v19 = vld [vmem:[%s772_s3 + $0x68] sm:$0xff]  ;;  %v387_v22 = vld [vmem:[%s772_s3 + $0x58] sm:$0xff] }
  0x13   : > { %314 = vmatpush.msra.mxu0 %v303_v3  ;;  %v388_v20 = vld [vmem:[%s772_s3 + $0x60] sm:$0xff]  ;;  %v386_v23 = vld [vmem:[%s772_s3 + $0x50] sm:$0xff]  ;;  %v385_v25 = vld [vmem:[%s772_s3 + $0x48] sm:$0xff] }
  0x14   : > { %393 = vmatpush.msra.mxu1 %v390_v18  ;;  %v565_v21 = vld [vmem:[%s771_s2] ss:$0 sm:$0xff]  ;;  %v383_v29 = vld [vmem:[%s772_s3 + $0x38] sm:$0xff]  ;;  %v382_v31 = vld [vmem:[%s772_s3 + $0x30] sm:$0xff] }
  0x15   : > { %315 = vmatpush.msra.mxu0 %v302_v4  ;;  %v384_v27 = vld [vmem:[%s772_s3 + $0x40] sm:$0xff]  ;;  %v381_v33 = vld [vmem:[%s772_s3 + $0x28] sm:$0xff]  ;;  %v379_v39 = vld [vmem:[%s772_s3 + $0x18] sm:$0xff] }
  0x16   : > { %394 = vmatpush.msra.mxu1 %v389_v19  ;;  %v380_v36 = vld [vmem:[%s772_s3 + $0x20] sm:$0xff]  ;;  %v378_v42 = vld [vmem:[%s772_s3 + $0x10] sm:$0xff]  ;;  %v377_v45 = vld [vmem:[%s772_s3 + $0x8] sm:$0xff] }
  0x17   : > { %316 = vmatpush.msra.mxu0 %v301_v5  ;;  %v376_v47 = vld [vmem:[%s772_s3] sm:$0xff] }
  0x18   : > { %395 = vmatpush.msra.mxu1 %v388_v20 }
  0x19   : > { %317 = vmatpush.msra.mxu0 %v300_v6 }
  0x1a   : > { %396 = vmatpush.msra.mxu1 %v387_v22 }
  0x1b   : > { %318 = vmatpush.msra.mxu0 %v299_v7 }
  0x1c   : > { %397 = vmatpush.msra.mxu1 %v386_v23 }
  0x1d   : > { %319 = vmatpush.msra.mxu0 %v298_v8 }
  0x1e   : > { %398 = vmatpush.msra.mxu1 %v385_v25 }
  0x1f   : > { %320 = vmatpush.msra.mxu0 %v297_v9 }
  0x20   : > { %399 = vmatpush.msra.mxu1 %v384_v27 }
  0x21   : > { %321 = vmatpush.msra.mxu0 %v296_v10 }
  0x22   : > { %400 = vmatpush.msra.mxu1 %v383_v29 }
  0x23   : > { %322 = vmatpush.msra.mxu0 %v295_v11  ;;  %v566_v11 = vld [vmem:[%s773_s4] ss:$0 sm:$0xff] }
  0x24   : > { %401 = vmatpush.msra.mxu1 %v382_v31 }
  0x25   : > { %323 = vmatpush.msra.mxu0 %v294_v12 }
  0x26   : > { %402 = vmatpush.msra.mxu1 %v381_v33 }
  0x27   : > { %324 = vmatpush.msra.mxu0 %v293_v13 }
  0x28   : > { %403 = vmatpush.msra.mxu1 %v380_v36 }
  0x29   : > { %325 = vmatpush.msra.mxu0 %v292_v14 }
  0x2a   : > { %404 = vmatpush.msra.mxu1 %v379_v39 }
  0x2b   : > { %326 = vmatpush.msra.mxu0 %v291_v15 }
  0x2c   : > { %327 = vmatmul.f32.vlgmr.msra.gmra.mxu0 %v290_v16  ;;  %405 = vmatpush.msra.mxu1 %v378_v42 }
  0x2e   : > { %406 = vmatpush.msra.mxu1 %v377_v45 }
  0x30   : > { %407 = vmatpush.msra.mxu1 %v376_v47 }
  0xa9   : > { %v328_v24 = vpop.f32.mrf.mxu0 }
  0xaa   : > { %v329_v26 = vadd.f32 %v565_v21, %v328_v24 }
  0xac   : > { %v332_v28 = vmul.f32 0.70710677, %v329_v26  ;;  %v331_v8 = vmul.f32 0.5, %v329_v26 }
  0xae   : > { %v333_v30 = vmul.f32 %v332_v28, %v332_v28 }
  0xb0   : > { %v334_v32 = vmin.f32 %v333_v30, 16.0 }
  0xb2   : > { %v335_v34 = vmul.f32 2.1237322e-06, %v334_v32  ;;  %v346_v35 = vmul.f32 3.8918573e-05, %v334_v32 }
  0xb4   : > { %v336_v37 = vadd.f32 0.00028619796, %v335_v34  ;;  %v347_v38 = vadd.f32 0.001143296, %v346_v35 }
  0xb6   : > { %v337_v40 = vmul.f32 %v336_v37, %v334_v32  ;;  %v348_v41 = vmul.f32 %v347_v38, %v334_v32 }
  0xb8   : > { %v349_v43 = vadd.f32 0.014752088, %v348_v41  ;;  %v338_v44 = vadd.f32 0.0036580483, %v337_v40 }
  0xba   : > { %v350_v46 = vmul.f32 %v349_v43, %v334_v32  ;;  %v339_v49 = vmul.f32 %v338_v44, %v334_v32 }
  0xbc   : > { %v351_v48 = vadd.f32 0.112945676, %v350_v46  ;;  %v340_v52 = vadd.f32 0.05243302, %v339_v49 }
  0xbe   : > { %v352_v50 = vmul.f32 %v351_v48, %v334_v32  ;;  %v341_v55 = vmul.f32 %v340_v52, %v334_v32 }
  0xc0   : > { %v353_v51 = vadd.f32 0.4994258, %v352_v50  ;;  %v342_v56 = vadd.f32 0.18741608, %v341_v55 }
  0xc2   : > { %v354_v53 = vmul.f32 %v353_v51, %v334_v32  ;;  %v343_v58 = vmul.f32 %v342_v56, %v334_v32 }
  0xc4   : > { %v355_v54 = vadd.f32 1.0, %v354_v53  ;;  %v344_v62 = vadd.f32 1.1283791, %v343_v58 }
  0xc6   : > { %567 = vrcp.f32 %v355_v54  ;;  %v367_v61 = vand.u32 2147483648, %v355_v54  ;;  %v365_v0 = vand.u32 2147483647, %v355_v54  ;;  %vm361_vm1 = vweird.f32 %v355_v54 }
  0xc7   : > { %v345_v3 = vmul.f32 %v344_v62, %v332_v28 }
  0xc8   : > { %v368_v2 = vor.u32 1.1754944e-38, %v367_v61  ;;  %vm366_vm3 = vcmp.eq.f32.partialorder %v365_v0, 8.507059e+37 }
  0xcc   : > { %v568_v57 = vpop.eup %567 }
  0xcd   : > { %v357_v59 = vmul.f32 %v568_v57, %v355_v54  ;;  %vm362_vm0 = vweird.f32 %v568_v57 }
  0xce   : > { %vm363_vm2 = vmor %vm361_vm1, %vm362_vm0 }
  0xcf   : > { %v358_v60 = vsub.f32 1.0, %v357_v59 }
  0xd1   : > { %v359_v63 = vmul.f32 %v568_v57, %v358_v60 }
  0xd3   : > { %v360_v1 = vadd.f32 %v568_v57, %v359_v63 }
  0xd5   : > { %v364_v4 = vsel %vm363_vm2, %v568_v57, %v360_v1 }
  0xd6   : > { %v369_v5 = vsel %vm366_vm3, %v368_v2, %v364_v4 }
  0xd7   : > { %v370_v6 = vmul.f32 %v369_v5, %v345_v3 }
  0xd9   : > { %v538_v7 = vclamps-f32 %v370_v6, 1.0 }
  0xdb   : > { %v373_v9 = vadd.f32 1.0, %v538_v7 }
  0xdd   : > { %v374_v10 = vmul.f32 %v373_v9, %v331_v8 }
  0xdf   : > { %408 = vmatmul.f32.vlgmr.msra.gmra.mxu1 %v374_v10 }
 0x15c   : > { %v409_v12 = vpop.f32.mrf.mxu1 }
 0x15d   : > { %v422_v13 = vadd.f32 %v566_v11, %v409_v12 }
 0x15f   : > { %423 = vst [vmem:[%s284_s10] sm:$0xff] %v422_v13 }
 0x160 PF: > { %s15_s20 = sadd.s32 1, %s591_s20   ;;  %s775_s18 = smov %s587_s19 }
 0x161   : > { %p12_p5 = scmp.ge.s32.totalorder %s15_s20, 4   ;;  %s776_s19 = smov %s778_s21 }
 0x163   :  { %14 = sbr.rel (!%p12_p5) target bundleno = 2 (0x2), region = 87 }

</bundles_post_ra>
